<compile_context>
chip_gen: v6e
topology: v6e:2x2x1
jax: 0.10.0
libtpu: 0.0.40
codegen_flags: <defaults>
</compile_context>

<pallas_src>
import functools

import jax
import jax.numpy as jnp
from jax.experimental import pallas as pl
from jax.experimental.pallas import tpu as pltpu


_INV_SQRT2 = 0.7071067811865476


def _erf_poly(x):
    """Abramowitz & Stegun 7.1.26 erf approximation (max abs err ~1.5e-7)."""
    # TODO(synk): switch to jax.lax.erf once Mosaic lowering for erf_p is confirmed.
    p = jnp.float32(0.3275911)
    a1 = jnp.float32(0.254829592)
    a2 = jnp.float32(-0.284496736)
    a3 = jnp.float32(1.421413741)
    a4 = jnp.float32(-1.453152027)
    a5 = jnp.float32(1.061405429)
    ax = jnp.abs(x)
    t = 1.0 / (1.0 + p * ax)
    poly = ((((a5 * t + a4) * t + a3) * t + a2) * t + a1) * t
    y = 1.0 - poly * jnp.exp(-ax * ax)   # exp -> EUP slot (effectively free next to MXU work)
    return jnp.where(x >= 0, y, -y)


def _gelu_exact(v):
    """Exact (erf-based) GELU, matching torch.nn.functional.gelu's default."""
    return jnp.float32(0.5) * v * (1.0 + _erf_poly(v * jnp.float32(_INV_SQRT2)))


def _ffn_kernel(x_ref, w1a_ref, w1b_ref, g_ref, w2_ref, o_ref, *, eps):
    x = x_ref[...]

    # Linear(dim -> 2*inner, bias=False), already split into GEGLU value/gate halves.
    u = jnp.dot(x, w1a_ref[...], preferred_element_type=jnp.float32)
    v = jnp.dot(x, w1b_ref[...], preferred_element_type=jnp.float32)

    # GEGLU: value * gelu(gate)  (exact erf-based gelu, torch default).
    h = u * _gelu_exact(v)

    # Gamma-only LayerNorm, biased variance (torch unbiased=False), f32 math.
    mean = jnp.mean(h, axis=-1, keepdims=True)
    diff = h - mean
    var = jnp.mean(diff * diff, axis=-1, keepdims=True)
    h_ln = diff * jax.lax.rsqrt(var + jnp.float32(eps)) * g_ref[...].astype(jnp.float32)

    # Dropout(p=0.0) is the identity in the forward pass.
    # TODO(synk): training-mode dropout (p > 0) would need pltpu.prng_seed / prng_random_bits.

    # Linear(inner -> dim, bias=False).
    out = jnp.dot(h_ln.astype(w2_ref.dtype), w2_ref[...],
                  preferred_element_type=jnp.float32)
    o_ref[...] = out.astype(o_ref.dtype)


def _round_up(n, m):
    return ((n + m - 1) // m) * m


def _working_set_bytes(t, dim, inner, itemsize):
    """Conservative per-call VMEM working-set estimate for a row tile of t."""
    # Weight blocks are grid-invariant but Pallas still double-buffers them.
    weight_bytes = 2 * (2 * dim * inner + inner * dim + inner) * itemsize
    io_bytes = 2 * 2 * t * dim * itemsize          # x and out tiles, double-buffered
    scratch_bytes = 4 * t * inner * 4              # f32 intermediates (u, v, h, temporaries)
    return weight_bytes + io_bytes + scratch_bytes


def _pick_tile_rows(n_rows, dim, inner, itemsize, tile_rows_max, vmem_budget_bytes):
    """Largest row tile (multiple of 8, <= tile_rows_max) whose working set fits the budget."""
    t = _round_up(min(tile_rows_max, _round_up(n_rows, 8)), 8)
    while t > 8 and _working_set_bytes(t, dim, inner, itemsize) > vmem_budget_bytes:
        t = _round_up(t // 2, 8)
    return max(t, 8)


def feedforward_pallas(x, w1, g, w2, *, tile_rows=256, vmem_budget_bytes=24 << 20):
    """Fused FeedForward forward pass.

    x:  (..., dim)
    w1: (dim, 2*inner)   == torch Linear(dim, inner*2, bias=False).weight.T
    g:  (inner,)         LayerNorm gamma
    w2: (inner, dim)     == torch Linear(inner, dim, bias=False).weight.T
    """
    orig_shape = x.shape
    dim = orig_shape[-1]
    inner = w2.shape[0]
    assert w1.shape == (dim, 2 * inner), (w1.shape, dim, inner)
    assert g.shape == (inner,), g.shape
    assert w2.shape == (inner, dim), w2.shape

    eps = 1e-5 if x.dtype == jnp.float32 else 1e-3

    x2d = x.reshape(-1, dim)
    n_rows = x2d.shape[0]
    itemsize = x2d.dtype.itemsize

    t = _pick_tile_rows(n_rows, dim, inner, itemsize, tile_rows, vmem_budget_bytes)
    n_rows_padded = _round_up(n_rows, t)
    if n_rows_padded != n_rows:
        x2d = jnp.pad(x2d, ((0, n_rows_padded - n_rows), (0, 0)))
    n_tiles = n_rows_padded // t

    w1a = w1[:, :inner]       # "value" half of the GEGLU projection
    w1b = w1[:, inner:]       # "gate" half
    g2d = g.reshape(1, inner)

    # VMEM limit with headroom; keep well under v7x's 64 MiB physical VMEM.
    est = _working_set_bytes(t, dim, inner, itemsize)
    vmem_limit = int(min(48 << 20, max(32 << 20, 2 * est)))

    # Advisory cost estimate for the XLA scheduler.
    flops = 6 * n_rows_padded * dim * inner                   # 2 GEMMs (dim->2*inner, inner->dim)
    transcendentals = 2 * n_rows_padded * inner               # exp in gelu, rsqrt amortized
    bytes_accessed = (n_rows_padded * dim * 2 * itemsize      # x in, y out
                      + (2 * dim * inner + inner * dim + inner) * itemsize)

    out = pl.pallas_call(
        functools.partial(_ffn_kernel, eps=float(eps)),
        out_shape=jax.ShapeDtypeStruct((n_rows_padded, dim), x.dtype),
        grid_spec=pltpu.PrefetchScalarGridSpec(
            num_scalar_prefetch=0,
            grid=(n_tiles,),
            in_specs=[
                pl.BlockSpec((t, dim), lambda i: (i, 0)),       # x rows (streamed)
                pl.BlockSpec((dim, inner), lambda i: (0, 0)),   # w1 value half (resident)
                pl.BlockSpec((dim, inner), lambda i: (0, 0)),   # w1 gate half (resident)
                pl.BlockSpec((1, inner), lambda i: (0, 0)),     # LayerNorm gamma (resident)
                pl.BlockSpec((inner, dim), lambda i: (0, 0)),   # w2 (resident)
            ],
            out_specs=pl.BlockSpec((t, dim), lambda i: (i, 0)),
        ),
        compiler_params=pltpu.CompilerParams(
            dimension_semantics=("parallel",),   # independent row tiles -> megacore shard on v7x
            vmem_limit_bytes=vmem_limit,
        ),
        cost_estimate=pl.CostEstimate(
            flops=flops, transcendentals=transcendentals,
            bytes_accessed=bytes_accessed),
    )(x2d, w1a, w1b, g2d, w2)

    return out[:n_rows].reshape(orig_shape)


def feedforward_ref(x, w1, g, w2):
    """Pure-JAX reference mirroring the PyTorch FeedForward forward pass."""
    eps = 1e-5 if x.dtype == jnp.float32 else 1e-3
    inner = w2.shape[0]
    h = jnp.dot(x, w1)
    u, v = h[..., :inner], h[..., inner:]
    a = u * jax.nn.gelu(v, approximate=False)   # true erf gelu (independent of kernel's polynomial)
    mean = jnp.mean(a, axis=-1, keepdims=True)
    var = jnp.mean((a - mean) ** 2, axis=-1, keepdims=True)
    a = (a - mean) * jax.lax.rsqrt(var + eps) * g
    return jnp.dot(a, w2).astype(x.dtype)


if __name__ == "__main__":
    key = jax.random.PRNGKey(0)
    batch, seq, dim, mult = 2, 8, 32, 4
    inner = dim * mult  # 128

    kx, k1, k2 = jax.random.split(key, 3)
    x = jax.random.normal(kx, (batch, seq, dim), dtype=jnp.float32)
    # torch Linear weights, stored already transposed (in_features, out_features).
    w1 = jax.random.normal(k1, (dim, 2 * inner), dtype=jnp.float32) / jnp.sqrt(dim)
    w2 = jax.random.normal(k2, (inner, dim), dtype=jnp.float32) / jnp.sqrt(inner)
    g = jnp.ones((inner,), dtype=jnp.float32)   # LayerNorm gamma init = ones

    out = feedforward_pallas(x, w1, g, w2)
    out = jax.block_until_ready(out)

    ref = feedforward_ref(x, w1, g, w2)
    assert out.shape == x.shape and out.dtype == x.dtype
    assert jnp.allclose(out, ref, atol=2e-4, rtol=2e-4), (
        f"mismatch vs reference, max abs err = {jnp.max(jnp.abs(out - ref))}")

    print("KERNEL_OK")
</pallas_src>

<mosaic_0001>
module attributes {stable_mosaic.version = 11 : i64} {
  func.func @_ffn_kernel(%arg0: i32, %arg1: memref<16x32xf32, #tpu.memory_space<vmem>>, %arg2: memref<32x128xf32, #tpu.memory_space<vmem>>, %arg3: memref<32x128xf32, #tpu.memory_space<vmem>>, %arg4: memref<1x128xf32, #tpu.memory_space<vmem>>, %arg5: memref<128x32xf32, #tpu.memory_space<vmem>>, %arg6: memref<16x32xf32, #tpu.memory_space<vmem>>) attributes {dimension_semantics = [#tpu.dimension_semantics<parallel>], iteration_bounds = array<i64: 1>, scalar_prefetch = 0 : i64, scratch_operands = 0 : i64, tpu.core_type = #tpu.core_type<tc>, window_params = [{transform_indices = @transform_0, window_bounds = array<i64: 16, 32>}, {pipeline_mode = #tpu.pipeline_mode<synchronous>, transform_indices = @transform_1, window_bounds = array<i64: 32, 128>}, {pipeline_mode = #tpu.pipeline_mode<synchronous>, transform_indices = @transform_2, window_bounds = array<i64: 32, 128>}, {pipeline_mode = #tpu.pipeline_mode<synchronous>, transform_indices = @transform_3, window_bounds = array<i64: 1, 128>}, {pipeline_mode = #tpu.pipeline_mode<synchronous>, transform_indices = @transform_4, window_bounds = array<i64: 128, 32>}, {transform_indices = @transform_5, window_bounds = array<i64: 16, 32>}]} {
    %c0 = arith.constant 0 : index
    %c0_0 = arith.constant 0 : index
    %0 = vector.load %arg1[%c0, %c0_0] : memref<16x32xf32, #tpu.memory_space<vmem>>, vector<16x32xf32>
    %c0_1 = arith.constant 0 : index
    %c0_2 = arith.constant 0 : index
    %1 = vector.load %arg2[%c0_1, %c0_2] : memref<32x128xf32, #tpu.memory_space<vmem>>, vector<32x128xf32>
    %cst = arith.constant dense<0.000000e+00> : vector<16x128xf32>
    %2 = tpu.matmul %0, %1, %cst {dimension_numbers = #tpu.dot_dimension_numbers<[1], [0], [0], [1], [0, 0, 1, 1], [], []>} : vector<16x32xf32>, vector<32x128xf32>, vector<16x128xf32> -> vector<16x128xf32>
    %c0_3 = arith.constant 0 : index
    %c0_4 = arith.constant 0 : index
    %3 = vector.load %arg3[%c0_3, %c0_4] : memref<32x128xf32, #tpu.memory_space<vmem>>, vector<32x128xf32>
    %cst_5 = arith.constant dense<0.000000e+00> : vector<16x128xf32>
    %4 = tpu.matmul %0, %3, %cst_5 {dimension_numbers = #tpu.dot_dimension_numbers<[1], [0], [0], [1], [0, 0, 1, 1], [], []>} : vector<16x32xf32>, vector<32x128xf32>, vector<16x128xf32> -> vector<16x128xf32>
    %cst_6 = arith.constant 5.000000e-01 : f32
    %5 = vector.broadcast %cst_6 : f32 to vector<16x128xf32>
    %6 = arith.mulf %5, %4 : vector<16x128xf32>
    %cst_7 = arith.constant 0.707106769 : f32
    %7 = vector.broadcast %cst_7 : f32 to vector<16x128xf32>
    %8 = arith.mulf %4, %7 : vector<16x128xf32>
    %9 = math.absf %8 : vector<16x128xf32>
    %cst_8 = arith.constant 0.327591091 : f32
    %10 = vector.broadcast %cst_8 : f32 to vector<16x128xf32>
    %11 = arith.mulf %10, %9 : vector<16x128xf32>
    %cst_9 = arith.constant 1.000000e+00 : f32
    %12 = vector.broadcast %cst_9 : f32 to vector<16x128xf32>
    %13 = arith.addf %12, %11 : vector<16x128xf32>
    %cst_10 = arith.constant 1.000000e+00 : f32
    %14 = vector.broadcast %cst_10 : f32 to vector<16x128xf32>
    %15 = arith.divf %14, %13 : vector<16x128xf32>
    %cst_11 = arith.constant 1.06140542 : f32
    %16 = vector.broadcast %cst_11 : f32 to vector<16x128xf32>
    %17 = arith.mulf %16, %15 : vector<16x128xf32>
    %cst_12 = arith.constant -1.45315206 : f32
    %18 = vector.broadcast %cst_12 : f32 to vector<16x128xf32>
    %19 = arith.addf %17, %18 : vector<16x128xf32>
    %20 = arith.mulf %19, %15 : vector<16x128xf32>
    %cst_13 = arith.constant 1.42141378 : f32
    %21 = vector.broadcast %cst_13 : f32 to vector<16x128xf32>
    %22 = arith.addf %20, %21 : vector<16x128xf32>
    %23 = arith.mulf %22, %15 : vector<16x128xf32>
    %cst_14 = arith.constant -0.284496725 : f32
    %24 = vector.broadcast %cst_14 : f32 to vector<16x128xf32>
    %25 = arith.addf %23, %24 : vector<16x128xf32>
    %26 = arith.mulf %25, %15 : vector<16x128xf32>
    %cst_15 = arith.constant 0.254829586 : f32
    %27 = vector.broadcast %cst_15 : f32 to vector<16x128xf32>
    %28 = arith.addf %26, %27 : vector<16x128xf32>
    %29 = arith.mulf %28, %15 : vector<16x128xf32>
    %cst_16 = arith.constant 0.000000e+00 : f32
    %30 = vector.broadcast %cst_16 : f32 to vector<16x128xf32>
    %31 = arith.subf %30, %9 : vector<16x128xf32>
    %32 = arith.mulf %31, %9 : vector<16x128xf32>
    %33 = math.exp %32 : vector<16x128xf32>
    %34 = arith.mulf %29, %33 : vector<16x128xf32>
    %cst_17 = arith.constant 1.000000e+00 : f32
    %35 = vector.broadcast %cst_17 : f32 to vector<16x128xf32>
    %36 = arith.subf %35, %34 : vector<16x128xf32>
    %cst_18 = arith.constant 0.000000e+00 : f32
    %37 = vector.broadcast %cst_18 : f32 to vector<16x128xf32>
    %38 = arith.cmpf oge, %8, %37 : vector<16x128xf32>
    %cst_19 = arith.constant 0.000000e+00 : f32
    %39 = vector.broadcast %cst_19 : f32 to vector<16x128xf32>
    %40 = arith.subf %39, %36 : vector<16x128xf32>
    %41 = arith.select %38, %36, %40 : vector<16x128xi1>, vector<16x128xf32>
    %cst_20 = arith.constant 1.000000e+00 : f32
    %42 = vector.broadcast %cst_20 : f32 to vector<16x128xf32>
    %43 = arith.addf %42, %41 : vector<16x128xf32>
    %44 = arith.mulf %6, %43 : vector<16x128xf32>
    %45 = arith.mulf %2, %44 : vector<16x128xf32>
    %cst_21 = arith.constant dense<0.000000e+00> : vector<16xf32>
    %46 = vector.multi_reduction <add>, %45, %cst_21 [1] : vector<16x128xf32> to vector<16xf32>
    %47 = vector.shape_cast %46 : vector<16xf32> to vector<16x1xf32>
    %cst_22 = arith.constant 1.280000e+02 : f32
    %48 = vector.broadcast %cst_22 : f32 to vector<16x1xf32>
    %49 = arith.divf %47, %48 : vector<16x1xf32>
    %50 = vector.broadcast %49 : vector<16x1xf32> to vector<16x128xf32>
    %51 = arith.subf %45, %50 : vector<16x128xf32>
    %52 = arith.mulf %51, %51 : vector<16x128xf32>
    %cst_23 = arith.constant dense<0.000000e+00> : vector<16xf32>
    %53 = vector.multi_reduction <add>, %52, %cst_23 [1] : vector<16x128xf32> to vector<16xf32>
    %54 = vector.shape_cast %53 : vector<16xf32> to vector<16x1xf32>
    %cst_24 = arith.constant 1.280000e+02 : f32
    %55 = vector.broadcast %cst_24 : f32 to vector<16x1xf32>
    %56 = arith.divf %54, %55 : vector<16x1xf32>
    %cst_25 = arith.constant 9.99999974E-6 : f32
    %57 = vector.broadcast %cst_25 : f32 to vector<16x1xf32>
    %58 = arith.addf %56, %57 : vector<16x1xf32>
    %59 = math.rsqrt %58 : vector<16x1xf32>
    %60 = vector.broadcast %59 : vector<16x1xf32> to vector<16x128xf32>
    %61 = arith.mulf %51, %60 : vector<16x128xf32>
    %c0_26 = arith.constant 0 : index
    %c0_27 = arith.constant 0 : index
    %62 = vector.load %arg4[%c0_26, %c0_27] : memref<1x128xf32, #tpu.memory_space<vmem>>, vector<1x128xf32>
    %63 = vector.broadcast %62 : vector<1x128xf32> to vector<16x128xf32>
    %64 = arith.mulf %61, %63 : vector<16x128xf32>
    %c0_28 = arith.constant 0 : index
    %c0_29 = arith.constant 0 : index
    %65 = vector.load %arg5[%c0_28, %c0_29] : memref<128x32xf32, #tpu.memory_space<vmem>>, vector<128x32xf32>
    %cst_30 = arith.constant dense<0.000000e+00> : vector<16x32xf32>
    %66 = tpu.matmul %64, %65, %cst_30 {dimension_numbers = #tpu.dot_dimension_numbers<[1], [0], [0], [1], [0, 0, 1, 1], [], []>} : vector<16x128xf32>, vector<128x32xf32>, vector<16x32xf32> -> vector<16x32xf32>
    %c0_31 = arith.constant 0 : index
    %c0_32 = arith.constant 0 : index
    %67 = vector.load %arg6[%c0_31, %c0_32] : memref<16x32xf32, #tpu.memory_space<vmem>>, vector<16x32xf32>
    tpu.vector_store %arg6[%c0_31, %c0_32], %66 {strides = array<i32>} : memref<16x32xf32, #tpu.memory_space<vmem>>, vector<16x32xf32>,
    return
  }
  func.func @transform_0(%arg0: i32) -> (i32, i32) {
    %c0_i32 = arith.constant 0 : i32
    %c0_i32_0 = arith.constant 0 : i32
    return %arg0, %c0_i32 : i32, i32
  }
  func.func @transform_1(%arg0: i32) -> (i32, i32) {
    %c0_i32 = arith.constant 0 : i32
    %c0_i32_0 = arith.constant 0 : i32
    %c0_i32_1 = arith.constant 0 : i32
    return %c0_i32, %c0_i32_0 : i32, i32
  }
  func.func @transform_2(%arg0: i32) -> (i32, i32) {
    %c0_i32 = arith.constant 0 : i32
    %c0_i32_0 = arith.constant 0 : i32
    %c0_i32_1 = arith.constant 0 : i32
    return %c0_i32, %c0_i32_0 : i32, i32
  }
  func.func @transform_3(%arg0: i32) -> (i32, i32) {
    %c0_i32 = arith.constant 0 : i32
    %c0_i32_0 = arith.constant 0 : i32
    %c0_i32_1 = arith.constant 0 : i32
    return %c0_i32, %c0_i32_0 : i32, i32
  }
  func.func @transform_4(%arg0: i32) -> (i32, i32) {
    %c0_i32 = arith.constant 0 : i32
    %c0_i32_0 = arith.constant 0 : i32
    %c0_i32_1 = arith.constant 0 : i32
    return %c0_i32, %c0_i32_0 : i32, i32
  }
  func.func @transform_5(%arg0: i32) -> (i32, i32) {
    %c0_i32 = arith.constant 0 : i32
    %c0_i32_0 = arith.constant 0 : i32
    return %arg0, %c0_i32 : i32, i32
  }
}

</mosaic_0001>

<bundles_post_ra>
// kernel: tpu_custom_call.1
= control target key start
LH: loop header
LB: loop body
LE: loop exit
PB: predicated region body
PF: predicated region fallthrough
CT: control target
= control target key end

     0   :  { %vm27_vm0 = vcmask 261120   ;;  %s637_s0 = inlined_call_operand.vmem [shape: f32[16,32], index: 0, kind: input, shape index: {}]   ;;  %s638_s1 = inlined_call_operand.vmem [shape: f32[32,128], index: 1, kind: input, shape index: {}]   ;;  %s639_s2 = inlined_call_operand.vmem [shape: f32[32,128], index: 2, kind: input, shape index: {}]   ;;  %s640_s3 = inlined_call_operand.vmem [shape: f32[1,128], index: 3, kind: input, shape index: {}]   ;;  %s641_s4 = inlined_call_operand.vmem [shape: f32[128,32], index: 4, kind: input, shape index: {}]   ;;  %s642_s5 = inlined_call_operand.hbm [shape: f32[16,32], index: 5, kind: output, shape index: {}]  }
   0x1   :  { %v26_v0 = vld [vmem:[%s638_s1 + $0x18] sm:$0xff]  ;;  %v25_v1 = vld [vmem:[%s638_s1 + $0x10] sm:$0xff]  ;;  %v21_v2 = vld [vmem:[%s637_s0] sm:$0xff] }
   0x2   :  { %420 = vmatprep.subr.mxu1 %v26_v0  ;;  %v24_v3 = vld [vmem:[%s638_s1 + $0x8] sm:$0xff]  ;;  %428 = vmatprep.mubr.msk.f32.mxu1 %vm27_vm0, %v21_v2 }
   0x3   :  { %421 = vmatpush3.msra.mxu1 %v26_v0 }
   0x4   :  { %422 = vmatprep.subr.mxu1 %v25_v1 }
   0x5   :  { %10 = vsyncpa [#allocation3], 0  ;;  %423 = vmatpush3.msra.mxu1 %v25_v1  ;;  %v23_v4 = vld [vmem:[%s638_s1] sm:$0xff]  ;;  %v22_v5 = vld [vmem:[%s637_s0 + $0x8] sm:$0xff] }
   0x6   :  { %424 = vmatprep.subr.mxu1 %v24_v3  ;;  %v112_v6 = vld [vmem:[%s639_s2 + $0x18] sm:$0xff]  ;;  %v111_v7 = vld [vmem:[%s639_s2 + $0x10] sm:$0xff]  ;;  %v110_v8 = vld [vmem:[%s639_s2 + $0x8] sm:$0xff] }
   0x7   :  { %425 = vmatpush3.msra.mxu1 %v24_v3  ;;  %v109_v9 = vld [vmem:[%s639_s2] sm:$0xff]  ;;  %v290_v3 = vld [vmem:[%s641_s4 + $0x70] sm:$0xff] }
   0x8   :  { %426 = vmatprep.subr.mxu1 %v23_v4 }
   0x9   :  { %427 = vmatpush3.msra.mxu1 %v23_v4  ;;  %v289_v4 = vld [vmem:[%s641_s4 + $0x68] sm:$0xff] }
   0xa   :  { %429 = vmatmul.mubr.msk.f32.vlgmr.msra.gmra.mxu1 %vm27_vm0, %v22_v5  ;;  %431 = vmatprep.subr.mxu1 %v112_v6 }
   0xb   :  { %432 = vmatpush3.msra.mxu1 %v112_v6  ;;  %439 = vmatprep.mubr.msk.f32.mxu1 %vm27_vm0, %v21_v2  ;;  %v291_v2 = vld [vmem:[%s641_s4 + $0x78] sm:$0xff] }
   0xc   :  { %433 = vmatprep.subr.mxu1 %v111_v7  ;;  %442 = vmatprep.subr.mxu0 %v291_v2 }
   0xd   :  { %434 = vmatpush3.msra.mxu1 %v111_v7  ;;  %443 = vmatpush3.msra.mxu0 %v291_v2 }
   0xe   :  { %435 = vmatprep.subr.mxu1 %v110_v8  ;;  %444 = vmatprep.subr.mxu0 %v290_v3 }
   0xf   :  { %436 = vmatpush3.msra.mxu1 %v110_v8  ;;  %445 = vmatpush3.msra.mxu0 %v290_v3 }
  0x10   :  { %437 = vmatprep.subr.mxu1 %v109_v9  ;;  %446 = vmatprep.subr.mxu0 %v289_v4 }
  0x11   :  { %438 = vmatpush3.msra.mxu1 %v109_v9  ;;  %447 = vmatpush3.msra.mxu0 %v289_v4 }
  0x12   :  { %440 = vmatmul.mubr.msk.f32.vlgmr.msra.gmra.mxu1 %vm27_vm0, %v22_v5 }
  0xca   :  { %v430_v10 = vpop.f32.mrf.mxu1 }
  0xcc   :  { %v100_v11 = vpop.f32.mrf.mxu1 }
  0xd2   :  { %v441_v12 = vpop.f32.mrf.mxu1 }
  0xd3   :  { %v191_v13 = vmul.f32 0.70710677, %v441_v12  ;;  %v189_v61 = vmul.f32 0.5, %v441_v12 }
  0xd4   :  { %v179_v14 = vpop.f32.mrf.mxu1 }
  0xd5   :  { %v193_v15 = vand.u32 2147483647, %v191_v13  ;;  %v190_v16 = vmul.f32 0.70710677, %v179_v14  ;;  %vm233_vm1 = vcmp.ge.f32.partialorder %v191_v13, 0.0  ;;  %v188_v58 = vmul.f32 0.5, %v179_v14 }
  0xd6   :  { %v288_v13 = vld [vmem:[%s641_s4 + $0x60] sm:$0xff]  ;;  %v287_v14 = vld [vmem:[%s641_s4 + $0x58] sm:$0xff] }
  0xd7   :  { %v195_v17 = vmul.f32 0.3275911, %v193_v15  ;;  %v192_v18 = vand.u32 2147483647, %v190_v16  ;;  %v221_v22 = vsub.f32 0.0, %v193_v15  ;;  %vm232_vm2 = vcmp.ge.f32.partialorder %v190_v16, 0.0  ;;  %448 = vmatprep.subr.mxu0 %v288_v13 }
  0xd8   :  { %449 = vmatpush3.msra.mxu0 %v288_v13  ;;  %v285_v16 = vld [vmem:[%s641_s4 + $0x48] sm:$0xff] }
  0xd9   :  { %v197_v19 = vadd.f32 1.0, %v195_v17  ;;  %v194_v20 = vmul.f32 0.3275911, %v192_v18  ;;  %v220_v23 = vsub.f32 0.0, %v192_v18  ;;  %v223_v24 = vmul.f32 %v221_v22, %v193_v15  ;;  %450 = vmatprep.subr.mxu0 %v287_v14  ;;  %v286_v15 = vld [vmem:[%s641_s4 + $0x50] sm:$0xff]  ;;  %v284_v17 = vld [vmem:[%s641_s4 + $0x40] sm:$0xff] }
  0xda   :  { %451 = vmatpush3.msra.mxu0 %v287_v14  ;;  %v279_v22 = vld [vmem:[%s641_s4 + $0x18] sm:$0xff] }
  0xdb   :  { %480 = vrcp.f32 %v197_v19  ;;  %v196_v21 = vadd.f32 1.0, %v194_v20  ;;  %v222_v26 = vmul.f32 %v220_v23, %v192_v18  ;;  %v226_v27 = vmul.f32 1.442695, %v223_v24  ;;  %452 = vmatprep.subr.mxu0 %v286_v15  ;;  %v283_v18 = vld [vmem:[%s641_s4 + $0x38] sm:$0xff]  ;;  %v282_v19 = vld [vmem:[%s641_s4 + $0x30] sm:$0xff]  ;;  %v281_v20 = vld [vmem:[%s641_s4 + $0x28] sm:$0xff] }
  0xdc   :  { %453 = vmatpush3.msra.mxu0 %v286_v15  ;;  %v278_v23 = vld [vmem:[%s641_s4 + $0x10] sm:$0xff]  ;;  %v277_v24 = vld [vmem:[%s641_s4 + $0x8] sm:$0xff] }
  0xdd   :  { %482 = vrcp.f32 %v196_v21  ;;  %v224_v32 = vmul.f32 1.442695, %v222_v26  ;;  %454 = vmatprep.subr.mxu0 %v285_v16  ;;  %v280_v21 = vld [vmem:[%s641_s4 + $0x20] sm:$0xff] }
  0xde   :  { %484 = vpow2.f32 %v226_v27  ;;  %455 = vmatpush3.msra.mxu0 %v285_v16 }
  0xdf   :  { %486 = vpow2.f32 %v224_v32  ;;  %456 = vmatprep.subr.mxu0 %v284_v17 }
  0xe0   :  { %457 = vmatpush3.msra.mxu0 %v284_v17 }
  0xe1   :  { %458 = vmatprep.subr.mxu0 %v283_v18 }
  0xe2   :  { %459 = vmatpush3.msra.mxu0 %v283_v18 }
  0xe3   :  { %460 = vmatprep.subr.mxu0 %v282_v19 }
  0xe4   :  { %461 = vmatpush3.msra.mxu0 %v282_v19 }
  0xe5   :  { %462 = vmatprep.subr.mxu0 %v281_v20 }
  0xe6   :  { %463 = vmatpush3.msra.mxu0 %v281_v20 }
  0xe7   :  { %464 = vmatprep.subr.mxu0 %v280_v21 }
  0xe8   :  { %v481_v25 = vpop.eup %480  ;;  %465 = vmatpush3.msra.mxu0 %v280_v21 }
  0xe9   :  { %v203_v28 = vmul.f32 1.0614054, %v481_v25  ;;  %466 = vmatprep.subr.mxu0 %v279_v22 }
  0xea   :  { %v483_v29 = vpop.eup %482  ;;  %467 = vmatpush3.msra.mxu0 %v279_v22 }
  0xeb   :  { %v205_v30 = vadd.f32 -1.4531521, %v203_v28  ;;  %v202_v31 = vmul.f32 1.0614054, %v483_v29  ;;  %v485_v46 = vpop.eup %484  ;;  %468 = vmatprep.subr.mxu0 %v278_v23 }
  0xec   :  { %v487_v50 = vpop.eup %486  ;;  %469 = vmatpush3.msra.mxu0 %v278_v23 }
  0xed   :  { %v207_v33 = vmul.f32 %v481_v25, %v205_v30  ;;  %v204_v34 = vadd.f32 -1.4531521, %v202_v31  ;;  %470 = vmatprep.subr.mxu0 %v277_v24 }
  0xee   :  { %471 = vmatpush3.msra.mxu0 %v277_v24 }
  0xef   :  { %v209_v35 = vadd.f32 1.4214138, %v207_v33  ;;  %v206_v36 = vmul.f32 %v483_v29, %v204_v34  ;;  %v389_v33 = vld [vmem:[%s640_s3] ss:$0 sm:$0xff] }
  0xf1   :  { %v211_v37 = vmul.f32 %v481_v25, %v209_v35  ;;  %v208_v38 = vadd.f32 1.4214138, %v206_v36 }
  0xf3   :  { %v213_v39 = vadd.f32 -0.28449672, %v211_v37  ;;  %v210_v40 = vmul.f32 %v483_v29, %v208_v38 }
  0xf5   :  { %v215_v41 = vmul.f32 %v481_v25, %v213_v39  ;;  %v212_v42 = vadd.f32 -0.28449672, %v210_v40 }
  0xf7   :  { %v217_v43 = vadd.f32 0.2548296, %v215_v41  ;;  %v214_v44 = vmul.f32 %v483_v29, %v212_v42 }
  0xf9   :  { %v219_v45 = vmul.f32 %v481_v25, %v217_v43  ;;  %v216_v47 = vadd.f32 0.2548296, %v214_v44  ;;  %v276_v25 = vld [vmem:[%s641_s4] sm:$0xff]  ;;  %s514_s4 = smov [#allocation2]  }
  0xfa   :  { %472 = vmatprep.subr.mxu0 %v276_v25  ;;  %s374_s16 = sshll.u32 %s514_s4, 4  ;;  %s375_s16 = int_to_ptr.vmem [resolvable:$true] %s374_s16 }
  0xfb   :  { %v229_v48 = vmul.f32 %v485_v46, %v219_v45  ;;  %v218_v49 = vmul.f32 %v483_v29, %v216_v47  ;;  %473 = vmatpush3.msra.mxu0 %v276_v25  ;;  %s492_s17 = scalar_lea.vmem %s375_s16, 256  ;;  %p497_p1 = scmp.lt.s32.totalorder %s375_s16, %s375_s16 }
  0xfc   :  { %p493_p0 = scmp.ne.s32.totalorder %s375_s16, %s492_s17  ;;  %p498_p2 = scmp.lt.s32.totalorder %s492_s17, %s492_s17 }
  0xfd   :  { %v231_v51 = vsub.f32 1.0, %v229_v48  ;;  %v228_v52 = vmul.f32 %v487_v50, %v218_v49 }
  0xfe   :  { %p499_p3 = por %p498_p2, %p497_p1 }
  0xff   :  { %v235_v53 = vsub.f32 0.0, %v231_v51  ;;  %v230_v54 = vsub.f32 1.0, %v228_v52 }
 0x100   :  { %p500_p4 = pnand %p499_p3, %p493_p0 }
 0x101   :  { %v234_v55 = vsub.f32 0.0, %v230_v54  ;;  %v237_v56 = vsel %vm233_vm1, %v231_v51, %v235_v53 }
 0x102   :  { %v239_v60 = vadd.f32 1.0, %v237_v56 }
 0x103   :  { %v236_v57 = vsel %vm232_vm2, %v230_v54, %v234_v55 }
 0x104   :  { %v238_v59 = vadd.f32 1.0, %v236_v57  ;;  %v241_v0 = vmul.f32 %v239_v60, %v189_v61 }
 0x106   :  { %v240_v62 = vmul.f32 %v238_v59, %v188_v58  ;;  %v243_v1 = vmul.f32 %v430_v10, %v241_v0 }
 0x108   :  { %v242_v63 = vmul.f32 %v240_v62, %v100_v11 }
 0x10a   :  { %244 = vadd.xlane.f32.xlu0 %v242_v63 }
 0x10e   :  { %246 = vadd.xlane.f32.xlu0 %v243_v1 }
 0x193   :  { %v245_v5 = vpop.xlane.xlu0 %244 }
 0x194   :  { %v249_v6 = vmul.f32 0.0078125, %v245_v5 }
 0x196   :  { %v251_v7 = vsub.f32 %v242_v63, %v249_v6 }
 0x197   :  { %v247_v8 = vpop.xlane.xlu0 %246 }
 0x198   :  { %v250_v9 = vmul.f32 0.0078125, %v247_v8  ;;  %v253_v10 = vmul.f32 %v251_v7, %v251_v7 }
 0x19a   :  { %v252_v11 = vsub.f32 %v243_v1, %v250_v9  ;;  %255 = vadd.xlane.f32.xlu1 %v253_v10 }
 0x19c   :  { %v254_v12 = vmul.f32 %v252_v11, %v252_v11 }
 0x19e   :  { %257 = vadd.xlane.f32.xlu1 %v254_v12 }
 0x223   :  { %v256_v26 = vpop.xlane.xlu1 %255 }
 0x224   :  { %v259_v27 = vmul.f32 0.0078125, %v256_v26 }
 0x226   :  { %v261_v28 = vadd.f32 1e-05, %v259_v27 }
 0x227   :  { %v258_v29 = vpop.xlane.xlu1 %257 }
 0x228   :  { %488 = vrsqrt.f32 %v261_v28  ;;  %v260_v30 = vmul.f32 0.0078125, %v258_v29 }
 0x22a   :  { %v262_v31 = vadd.f32 1e-05, %v260_v30 }
 0x22c   :  { %490 = vrsqrt.f32 %v262_v31 }
 0x235   :  { %v489_v32 = vpop.eup %488 }
 0x236   :  { %v265_v34 = vmul.f32 %v489_v32, %v251_v7 }
 0x238   :  { %v274_v35 = vmul.f32 %v389_v33, %v265_v34 }
 0x239   :  { %v491_v36 = vpop.eup %490 }
 0x23a   :  { %v266_v37 = vmul.f32 %v491_v36, %v252_v11  ;;  %474 = vmatprep.mubr.f32.mxu0 %v274_v35 }
 0x23c   :  { %v275_v38 = vmul.f32 %v389_v33, %v266_v37 }
 0x23e   :  { %475 = vmatmul.mubr.f32.vlgmr.msra.gmra.mxu0 %v275_v38 }
 0x2fe   :  { %v476_v39 = vpop.f32.mrf.mxu0 }
 0x2ff   :  { %368 = vst.msk [vmem:[#allocation2 + $0x8] sm:$0xff] %vm27_vm0, %v476_v39 }
 0x300   :  { %v358_v40 = vpop.f32.mrf.mxu0 }
 0x301   :  { %367 = vst.msk [vmem:[#allocation2] sm:$0xff] %vm27_vm0, %v358_v40 }
 0x302   :  { %503 = shalt.err (!%p500_p4)
}
 0x303   :  { %s515_s3 = smov 128   ;;  %s516_s18 = smov 8  }
 0x304   :  { %380 = dma.vmem_to_hbm [thread:$0]  %s375_s16, 256, %s642_s5, [#allocation3], %s515_s3, %s515_s3, %s516_s18  }
 0x305   :  { %512 = dma.done.wait [#allocation3], 256  }
 0x306   :  { %513 = vsyncadd [#allocation3], 4294967040 }
 0x307   :  { %384 = vsyncpa [#allocation3], 1 }

</bundles_post_ra>
